<compile_context>
chip_gen: v7x
topology: tpu7x:2x2x1
jax: 0.10.0
libtpu: 0.0.40
codegen_flags: <defaults>
</compile_context>

<pallas_src>
import functools

import jax
import jax.numpy as jnp
from jax.experimental import pallas as pl
from jax.experimental.pallas import tpu as pltpu


_LANE = 128
_SUBLANE = 8


def _round_up(n, m):
    return ((n + m - 1) // m) * m


def _pad_to(a, target_shape):
    pads = [(0, t - s) for s, t in zip(a.shape, target_shape)]
    if any(p[1] for p in pads):
        return jnp.pad(a, pads)
    return a


# ---------------------------------------------------------------------------
# Kernels
# ---------------------------------------------------------------------------
def _ffn_kernel_single(x_ref, w1_ref, b1_ref, w2_ref, b2_ref, o_ref):
    """nf == 1: whole hidden dim in one slab, no accumulation needed."""
    h = jnp.dot(x_ref[...], w1_ref[...], preferred_element_type=jnp.float32)
    h = jnp.maximum(h + b1_ref[...].astype(jnp.float32), 0.0)
    acc = jnp.dot(h.astype(w2_ref.dtype), w2_ref[...],
                  preferred_element_type=jnp.float32)
    o_ref[...] = (acc + b2_ref[...].astype(jnp.float32)).astype(o_ref.dtype)


def _ffn_kernel_acc_out(x_ref, w1_ref, b1_ref, w2_ref, b2_ref, o_ref):
    """nf > 1, f32 output: accumulate straight into the resident output tile."""
    f = pl.program_id(1)

    @pl.when(f == 0)
    def _():
        o_ref[...] = jnp.zeros_like(o_ref)

    h = jnp.dot(x_ref[...], w1_ref[...], preferred_element_type=jnp.float32)
    h = jnp.maximum(h + b1_ref[...].astype(jnp.float32), 0.0)
    o_ref[...] += jnp.dot(h.astype(w2_ref.dtype), w2_ref[...],
                          preferred_element_type=jnp.float32)

    @pl.when(f == pl.num_programs(1) - 1)
    def _():
        o_ref[...] += b2_ref[...].astype(jnp.float32)


def _ffn_kernel_scratch(x_ref, w1_ref, b1_ref, w2_ref, b2_ref, o_ref, acc_ref):
    """nf > 1, low-precision output: f32 scratch accumulator."""
    f = pl.program_id(1)

    @pl.when(f == 0)
    def _():
        acc_ref[...] = jnp.zeros_like(acc_ref)

    h = jnp.dot(x_ref[...], w1_ref[...], preferred_element_type=jnp.float32)
    h = jnp.maximum(h + b1_ref[...].astype(jnp.float32), 0.0)
    acc_ref[...] += jnp.dot(h.astype(w2_ref.dtype), w2_ref[...],
                            preferred_element_type=jnp.float32)

    @pl.when(f == pl.num_programs(1) - 1)
    def _():
        o_ref[...] = (acc_ref[...]
                      + b2_ref[...].astype(jnp.float32)).astype(o_ref.dtype)


# ---------------------------------------------------------------------------
# Generation-aware tile selection
# ---------------------------------------------------------------------------
@functools.lru_cache(maxsize=None)
def _vmem_capacity_bytes():
    try:
        return int(pltpu.get_tpu_info().vmem_capacity_bytes)
    except Exception:
        return 64 * 1024 * 1024  # conservative default (v7x per-TensorCore)


def _vmem_estimate(tm, tf, e_pad, act_itemsize, w_itemsize, use_scratch):
    v = 2 * tm * e_pad * act_itemsize         # x tile (double-buffered)
    v += 2 * e_pad * tf * w_itemsize          # W1 slab
    v += 2 * _SUBLANE * tf * w_itemsize       # b1 slab ((1,TF) -> 8 sublanes)
    v += 2 * tf * e_pad * w_itemsize          # W2 slab
    v += 2 * _SUBLANE * e_pad * w_itemsize    # b2
    v += 2 * tm * e_pad * act_itemsize        # out tile
    v += tm * tf * 4                          # f32 hidden slab (internal)
    if use_scratch:
        v += tm * e_pad * 4                   # f32 accumulator scratch
    return v


@functools.lru_cache(maxsize=None)
def _choose_tiles(m, e_pad, f_pad, act_itemsize, w_itemsize, out_is_f32):
    """Pick (TM, TF, vmem_cap).

    Priority: full-F weight residency first (weights DMA'd once for the whole
    kernel), then the largest token tile that fits the budget.  Keeps >= 2
    M tiles when M allows so the parallel axis can shard across v7x cores.
    """
    cap = _vmem_capacity_bytes()
    budget = max(cap - max(16 * 1024 * 1024, cap // 8), 8 * 1024 * 1024)

    tm_max = min(1024, _round_up(m, _SUBLANE))
    if m >= 512:
        tm_max = min(1024, max(256, _round_up(-(-m // 2), _SUBLANE)))
    tm_cands = sorted(
        {t for t in (1024, 768, 512, 384, 256, 128, 64, 32, 16, 8, tm_max)
         if 0 < t <= tm_max},
        reverse=True)

    # Full residency first, then slabs that divide the padded hidden dim.
    tf_cands = [f_pad] + [t for t in (4096, 2048, 1024, 512, 256, 128)
                          if t < f_pad and f_pad % t == 0]

    for tf in tf_cands:
        nf = f_pad // tf
        use_scratch = (nf > 1) and (not out_is_f32)
        for tm in tm_cands:
            if _vmem_estimate(tm, tf, e_pad, act_itemsize, w_itemsize,
                              use_scratch) <= budget:
                return tm, tf, cap
    return tm_cands[-1], 128, cap


# ---------------------------------------------------------------------------
# Wrapper
# ---------------------------------------------------------------------------
def prepare_ffn_params(w1, b1, w2, b2):
    """Pad the parameters once, outside the per-call hot path.

    w1: (E, F) = linear1.weight.T, b1: (F,), w2: (F, E) = linear2.weight.T,
    b2: (E,).
    """
    E, F = w1.shape
    e_pad = _round_up(E, _LANE)
    f_pad = _round_up(F, _LANE)
    return dict(
        w1=_pad_to(w1, (e_pad, f_pad)),
        b1=_pad_to(b1.reshape(1, F), (1, f_pad)),
        w2=_pad_to(w2, (f_pad, e_pad)),
        b2=_pad_to(b2.reshape(1, E), (1, e_pad)),
        embedding_dim=E,
        ff_dim=F,
    )


@functools.partial(jax.jit, static_argnames=("e", "f", "tm", "tf", "vmem_cap"))
def _feed_forward_impl(x, w1p, b1p, w2p, b2p, *, e, f, tm, tf, vmem_cap):
    B, S, _ = x.shape
    M = B * S
    e_pad, f_pad = w1p.shape
    nf = f_pad // tf
    m_pad = _round_up(M, tm)
    act_itemsize = jnp.dtype(x.dtype).itemsize
    w_itemsize = jnp.dtype(w1p.dtype).itemsize
    out_is_f32 = jnp.dtype(x.dtype) == jnp.float32

    x2 = _pad_to(x.reshape(M, e), (m_pad, e_pad))

    if nf == 1:
        kernel, scratch, out_dtype = _ffn_kernel_single, [], x.dtype
    elif out_is_f32:
        kernel, scratch, out_dtype = _ffn_kernel_acc_out, [], jnp.float32
    else:
        kernel = _ffn_kernel_scratch
        scratch = [pltpu.VMEM((tm, e_pad), jnp.float32)]
        out_dtype = x.dtype

    grid = (m_pad // tm, nf)

    est = _vmem_estimate(tm, tf, e_pad, act_itemsize, w_itemsize,
                         bool(scratch))
    vmem_limit = int(min(max(2 * est, 16 * 1024 * 1024),
                         vmem_cap - 4 * 1024 * 1024))

    weight_bytes = 2 * e_pad * f_pad * w_itemsize
    weight_passes = 1 if nf == 1 else (m_pad // tm)
    cost = pl.CostEstimate(
        flops=4 * M * e * f,
        transcendentals=0,
        bytes_accessed=int(weight_passes * weight_bytes
                           + 2 * m_pad * e_pad * act_itemsize),
    )

    out = pl.pallas_call(
        kernel,
        out_shape=jax.ShapeDtypeStruct((m_pad, e_pad), out_dtype),
        grid_spec=pltpu.PrefetchScalarGridSpec(
            num_scalar_prefetch=0,
            grid=grid,
            in_specs=[
                pl.BlockSpec((tm, e_pad), lambda i, fi: (i, 0)),   # x tile
                pl.BlockSpec((e_pad, tf), lambda i, fi: (0, fi)),  # W1 slab
                pl.BlockSpec((1, tf), lambda i, fi: (0, fi)),      # b1 slab
                pl.BlockSpec((tf, e_pad), lambda i, fi: (fi, 0)),  # W2 slab
                pl.BlockSpec((1, e_pad), lambda i, fi: (0, 0)),    # b2
            ],
            out_specs=pl.BlockSpec((tm, e_pad), lambda i, fi: (i, 0)),
            scratch_shapes=scratch,
        ),
        compiler_params=pltpu.CompilerParams(
            dimension_semantics=("parallel", "arbitrary"),
            vmem_limit_bytes=vmem_limit,
        ),
        cost_estimate=cost,
    )(x2, w1p, b1p, w2p, b2p)

    return out[:M, :e].astype(x.dtype).reshape(B, S, e)


def feed_forward(x, params, *, tile_m=None, tile_f=None):
    """x: (B, S, embedding_dim); params from prepare_ffn_params()."""
    B, S, E = x.shape
    assert E == params["embedding_dim"]
    e_pad, f_pad = params["w1"].shape
    M = B * S
    act_itemsize = jnp.dtype(x.dtype).itemsize
    w_itemsize = jnp.dtype(params["w1"].dtype).itemsize
    out_is_f32 = jnp.dtype(x.dtype) == jnp.float32

    tm, tf, cap = _choose_tiles(M, e_pad, f_pad, act_itemsize, w_itemsize,
                                out_is_f32)
    if tile_m is not None:  # optional manual override (testing / tuning)
        tm = max(_SUBLANE,
                 _round_up(min(tile_m, _round_up(M, _SUBLANE)), _SUBLANE))
    if tile_f is not None:
        tf_req = _round_up(min(tile_f, f_pad), _LANE)
        if f_pad % tf_req == 0:
            tf = tf_req

    return _feed_forward_impl(
        x, params["w1"], params["b1"], params["w2"], params["b2"],
        e=E, f=params["ff_dim"], tm=tm, tf=tf, vmem_cap=cap)


if __name__ == "__main__":
    # ---- test 1: small shapes, single-slab (nf == 1) fast path --------------
    B, S, E, F = 2, 8, 32, 64
    key = jax.random.PRNGKey(0)
    kx, k1, kb1, k2, kb2 = jax.random.split(key, 5)

    x = jax.random.normal(kx, (B, S, E), dtype=jnp.float32)
    # Stored pre-transposed vs. torch.nn.Linear (weight is (out,in); w = weight.T)
    w1 = jax.random.normal(k1, (E, F), dtype=jnp.float32) * 0.05
    b1 = jax.random.normal(kb1, (F,), dtype=jnp.float32) * 0.05
    w2 = jax.random.normal(k2, (F, E), dtype=jnp.float32) * 0.05
    b2 = jax.random.normal(kb2, (E,), dtype=jnp.float32) * 0.05

    params = prepare_ffn_params(w1, b1, w2, b2)
    out = jax.block_until_ready(feed_forward(x, params))

    ref = jnp.maximum(x.reshape(-1, E) @ w1 + b1, 0.0) @ w2 + b2
    ref = ref.reshape(B, S, E)
    assert jnp.allclose(out, ref, atol=1e-5, rtol=1e-5), "mismatch (single-slab)"

    # ---- test 2: exercise the multi-slab accumulation path ------------------
    B2, S2, E2, F2 = 2, 20, 48, 320
    kx, k1, kb1, k2, kb2 = jax.random.split(jax.random.PRNGKey(1), 5)
    x2 = jax.random.normal(kx, (B2, S2, E2), dtype=jnp.float32)
    w1b = jax.random.normal(k1, (E2, F2), dtype=jnp.float32) * 0.05
    b1b = jax.random.normal(kb1, (F2,), dtype=jnp.float32) * 0.05
    w2b = jax.random.normal(k2, (F2, E2), dtype=jnp.float32) * 0.05
    b2b = jax.random.normal(kb2, (E2,), dtype=jnp.float32) * 0.05

    params2 = prepare_ffn_params(w1b, b1b, w2b, b2b)
    out2 = jax.block_until_ready(
        feed_forward(x2, params2, tile_m=16, tile_f=128))  # nf=3, 3 M tiles

    ref2 = jnp.maximum(x2.reshape(-1, E2) @ w1b + b1b, 0.0) @ w2b + b2b
    ref2 = ref2.reshape(B2, S2, E2)
    assert jnp.allclose(out2, ref2, atol=1e-5, rtol=1e-5), "mismatch (multi-slab)"

    print("KERNEL_OK")
</pallas_src>

<mosaic_0001>
module attributes {stable_mosaic.version = 11 : i64} {
  func.func @_ffn_kernel_single(%arg0: i32, %arg1: i32, %arg2: memref<16x128xf32, #tpu.memory_space<vmem>>, %arg3: memref<128x128xf32, #tpu.memory_space<vmem>>, %arg4: memref<1x128xf32, #tpu.memory_space<vmem>>, %arg5: memref<128x128xf32, #tpu.memory_space<vmem>>, %arg6: memref<1x128xf32, #tpu.memory_space<vmem>>, %arg7: memref<16x128xf32, #tpu.memory_space<vmem>>) attributes {dimension_semantics = [#tpu.dimension_semantics<parallel>, #tpu.dimension_semantics<arbitrary>], iteration_bounds = array<i64: 1, 1>, scalar_prefetch = 0 : i64, scratch_operands = 0 : i64, tpu.core_type = #tpu.core_type<tc>, window_params = [{transform_indices = @transform_0, window_bounds = array<i64: 16, 128>}, {transform_indices = @transform_1, window_bounds = array<i64: 128, 128>}, {transform_indices = @transform_2, window_bounds = array<i64: 1, 128>}, {transform_indices = @transform_3, window_bounds = array<i64: 128, 128>}, {pipeline_mode = #tpu.pipeline_mode<synchronous>, transform_indices = @transform_4, window_bounds = array<i64: 1, 128>}, {transform_indices = @transform_5, window_bounds = array<i64: 16, 128>}]} {
    %c0 = arith.constant 0 : index
    %c0_0 = arith.constant 0 : index
    %0 = vector.load %arg2[%c0, %c0_0] : memref<16x128xf32, #tpu.memory_space<vmem>>, vector<16x128xf32>
    %c0_1 = arith.constant 0 : index
    %c0_2 = arith.constant 0 : index
    %1 = vector.load %arg3[%c0_1, %c0_2] : memref<128x128xf32, #tpu.memory_space<vmem>>, vector<128x128xf32>
    %cst = arith.constant dense<0.000000e+00> : vector<16x128xf32>
    %2 = tpu.matmul %0, %1, %cst {dimension_numbers = #tpu.dot_dimension_numbers<[1], [0], [0], [1], [0, 0, 1, 1], [], []>} : vector<16x128xf32>, vector<128x128xf32>, vector<16x128xf32> -> vector<16x128xf32>
    %c0_3 = arith.constant 0 : index
    %c0_4 = arith.constant 0 : index
    %3 = vector.load %arg4[%c0_3, %c0_4] : memref<1x128xf32, #tpu.memory_space<vmem>>, vector<1x128xf32>
    %4 = vector.broadcast %3 : vector<1x128xf32> to vector<16x128xf32>
    %5 = arith.addf %2, %4 : vector<16x128xf32>
    %cst_5 = arith.constant 0.000000e+00 : f32
    %6 = vector.broadcast %cst_5 : f32 to vector<16x128xf32>
    %7 = arith.maximumf %5, %6 : vector<16x128xf32>
    %c0_6 = arith.constant 0 : index
    %c0_7 = arith.constant 0 : index
    %8 = vector.load %arg5[%c0_6, %c0_7] : memref<128x128xf32, #tpu.memory_space<vmem>>, vector<128x128xf32>
    %cst_8 = arith.constant dense<0.000000e+00> : vector<16x128xf32>
    %9 = tpu.matmul %7, %8, %cst_8 {dimension_numbers = #tpu.dot_dimension_numbers<[1], [0], [0], [1], [0, 0, 1, 1], [], []>} : vector<16x128xf32>, vector<128x128xf32>, vector<16x128xf32> -> vector<16x128xf32>
    %c0_9 = arith.constant 0 : index
    %c0_10 = arith.constant 0 : index
    %10 = vector.load %arg6[%c0_9, %c0_10] : memref<1x128xf32, #tpu.memory_space<vmem>>, vector<1x128xf32>
    %11 = vector.broadcast %10 : vector<1x128xf32> to vector<16x128xf32>
    %12 = arith.addf %9, %11 : vector<16x128xf32>
    %c0_11 = arith.constant 0 : index
    %c0_12 = arith.constant 0 : index
    %13 = vector.load %arg7[%c0_11, %c0_12] : memref<16x128xf32, #tpu.memory_space<vmem>>, vector<16x128xf32>
    tpu.vector_store %arg7[%c0_11, %c0_12], %12 {strides = array<i32>} : memref<16x128xf32, #tpu.memory_space<vmem>>, vector<16x128xf32>,
    return
  }
  func.func @transform_0(%arg0: i32, %arg1: i32) -> (i32, i32) {
    %c0_i32 = arith.constant 0 : i32
    %c0_i32_0 = arith.constant 0 : i32
    return %arg0, %c0_i32 : i32, i32
  }
  func.func @transform_1(%arg0: i32, %arg1: i32) -> (i32, i32) {
    %c0_i32 = arith.constant 0 : i32
    %c0_i32_0 = arith.constant 0 : i32
    return %c0_i32, %arg1 : i32, i32
  }
  func.func @transform_2(%arg0: i32, %arg1: i32) -> (i32, i32) {
    %c0_i32 = arith.constant 0 : i32
    %c0_i32_0 = arith.constant 0 : i32
    return %c0_i32, %arg1 : i32, i32
  }
  func.func @transform_3(%arg0: i32, %arg1: i32) -> (i32, i32) {
    %c0_i32 = arith.constant 0 : i32
    %c0_i32_0 = arith.constant 0 : i32
    return %arg1, %c0_i32 : i32, i32
  }
  func.func @transform_4(%arg0: i32, %arg1: i32) -> (i32, i32) {
    %c0_i32 = arith.constant 0 : i32
    %c0_i32_0 = arith.constant 0 : i32
    %c0_i32_1 = arith.constant 0 : i32
    return %c0_i32, %c0_i32_0 : i32, i32
  }
  func.func @transform_5(%arg0: i32, %arg1: i32) -> (i32, i32) {
    %c0_i32 = arith.constant 0 : i32
    %c0_i32_0 = arith.constant 0 : i32
    return %arg0, %c0_i32 : i32, i32
  }
}

</mosaic_0001>

<bundles_post_ra>
// kernel: _feed_forward_impl.1
= control target key start
LH: loop header
LB: loop body
LE: loop exit
PB: predicated region body
PF: predicated region fallthrough
CT: control target
= control target key end

     0   :  { %10 = vsyncpa [#allocation3], 0  ;;  %s556_s0 = inlined_call_operand.vmem [shape: f32[16,128], index: 0, kind: input, shape index: {}]   ;;  %s557_s1 = inlined_call_operand.hbm [shape: f32[128,128], index: 1, kind: input, shape index: {}]   ;;  %s558_s2 = inlined_call_operand.vmem [shape: f32[1,128], index: 2, kind: input, shape index: {}]   ;;  %s559_s3 = inlined_call_operand.hbm [shape: f32[128,128], index: 3, kind: input, shape index: {}]   ;;  %s560_s4 = inlined_call_operand.vmem [shape: f32[1,128], index: 4, kind: input, shape index: {}]   ;;  %s561_s5 = inlined_call_operand.vmem [shape: f32[16,128], index: 5, kind: output, shape index: {}]  }
   0x1   :  { %11 = vsyncpa [#allocation5], 0  ;;  %s480_s18 = smov [#allocation2]   ;;  %s432_s22 = scalar_lea.hbm %s557_s1, 2048 }
   0x2   :  { %s19_s19 = sshll.u32 %s480_s18, 4  ;;  %p433_p0 = scmp.ne.s32.totalorder %s557_s1, %s432_s22  ;;  %s20_s19 = int_to_ptr.vmem [resolvable:$true] %s19_s19 }
   0x3   :  { %p436_p1 = scmp.lt.u32.totalorder %s432_s22, %s557_s1 }
   0x5   :  { %p438_p2 = pnand %p436_p1, %p433_p0 }
   0x7   :  { %441 = shalt.err (!%p438_p2)
}
   0x8   :  { %s442_s27 = scalar_lea.vmem %s20_s19, 2048  ;;  %p447_p4 = scmp.lt.s32.totalorder %s20_s19, %s20_s19 }
   0x9   :  { %p443_p3 = scmp.ne.s32.totalorder %s20_s19, %s442_s27  ;;  %p448_p5 = scmp.lt.s32.totalorder %s442_s27, %s442_s27 }
   0xb   :  { %p449_p6 = por %p448_p5, %p447_p4 }
   0xd   :  { %p450_p7 = pnand %p449_p6, %p443_p3 }
   0xf   :  { %453 = shalt.err (!%p450_p7)
}
  0x10   :  { %s481_s28 = smov 128   ;;  %s482_s29 = smov 8  }
  0x11   :  { %25 = dma.hbm_to_vmem [thread:$0]  %s557_s1, 2048, %s20_s19, [#allocation3], %s481_s28, %s481_s28, %s482_s29  }
  0x12   :  { %s483_s7 = smov [#allocation4]   ;;  %s454_s11 = scalar_lea.hbm %s559_s3, 2048 }
  0x13   :  { %s33_s8 = sshll.u32 %s483_s7, 4  ;;  %p455_p8 = scmp.ne.s32.totalorder %s559_s3, %s454_s11  ;;  %s34_s8 = int_to_ptr.vmem [resolvable:$true] %s33_s8 }
  0x14   :  { %p458_p9 = scmp.lt.u32.totalorder %s454_s11, %s559_s3 }
  0x16   :  { %p460_p10 = pnand %p458_p9, %p455_p8 }
  0x18   :  { %463 = shalt.err (!%p460_p10)
}
  0x19   :  { %s464_s16 = scalar_lea.vmem %s34_s8, 2048  ;;  %p469_p12 = scmp.lt.s32.totalorder %s34_s8, %s34_s8 }
  0x1a   :  { %p465_p11 = scmp.ne.s32.totalorder %s34_s8, %s464_s16  ;;  %p470_p13 = scmp.lt.s32.totalorder %s464_s16, %s464_s16 }
  0x1c   :  { %p471_p0 = por %p470_p13, %p469_p12 }
  0x1e   :  { %p472_p1 = pnand %p471_p0, %p465_p11 }
  0x20   :  { %475 = shalt.err (!%p472_p1)
}
  0x21   :  { %39 = dma.hbm_to_vmem [thread:$0]  %s559_s3, 2048, %s34_s8, [#allocation5], %s481_s28, %s481_s28, %s482_s29  }
  0x22   :  { %476 = dma.done.wait [#allocation3], 2048  }
  0x23   :  { %477 = vsyncadd [#allocation3], 4294965248 }
  0x24   :  { %478 = dma.done.wait [#allocation5], 2048  }
  0x25   :  { %479 = vsyncadd [#allocation5], 4294965248  ;;  %v50_v0 = vld [vmem:[#allocation2] sm:$0xff]  ;;  %v51_v1 = vld [vmem:[#allocation2 + $0x8] sm:$0xff] }
  0x26   :  { %v52_v2 = vld [vmem:[#allocation2 + $0x10] sm:$0xff]  ;;  %v364_v3 = vpack.c.bf16 %v51_v1, %v50_v0  ;;  %v53_v4 = vld [vmem:[#allocation2 + $0x18] sm:$0xff]  ;;  %v54_v6 = vld [vmem:[#allocation2 + $0x20] sm:$0xff] }
  0x27   :  { %v368_v5 = vpack.c.bf16 %v53_v4, %v52_v2  ;;  %v55_v7 = vld [vmem:[#allocation2 + $0x28] sm:$0xff]  ;;  %v56_v9 = vld [vmem:[#allocation2 + $0x30] sm:$0xff]  ;;  %v57_v10 = vld [vmem:[#allocation2 + $0x38] sm:$0xff] }
  0x28   :  { %365 = vmatprep.subr.bf16.mxu0 %v364_v3  ;;  %v372_v8 = vpack.c.bf16 %v55_v7, %v54_v6  ;;  %v48_v11 = vld [vmem:[%s556_s0] sm:$0xff]  ;;  %v151_v13 = vld [vmem:[#allocation4 + $0x8] sm:$0xff]  ;;  %v152_v14 = vld [vmem:[#allocation4 + $0x10] sm:$0xff]  ;;  %v376_v20 = vpack.c.bf16 %v57_v10, %v56_v9 }
  0x29   :  { %367 = vmatpush3.bf16.msra.mxu0 %v364_v3  ;;  %326 = vmatprep.mubr.f32.mxu0 %v48_v11  ;;  %v150_v12 = vld [vmem:[#allocation4] sm:$0xff]  ;;  %v153_v16 = vld [vmem:[#allocation4 + $0x18] sm:$0xff]  ;;  %v155_v19 = vld [vmem:[#allocation4 + $0x28] sm:$0xff] }
  0x2a   :  { %369 = vmatprep.subr.bf16.mxu0 %v368_v5  ;;  %v396_v15 = vpack.c.bf16 %v151_v13, %v150_v12  ;;  %v400_v17 = vpack.c.bf16 %v153_v16, %v152_v14  ;;  %v154_v18 = vld [vmem:[#allocation4 + $0x20] sm:$0xff]  ;;  %v59_v22 = vld [vmem:[#allocation2 + $0x48] sm:$0xff]  ;;  %v156_v24 = vld [vmem:[#allocation4 + $0x30] sm:$0xff] }
  0x2b   :  { %v58_v21 = vld [vmem:[#allocation2 + $0x40] sm:$0xff]  ;;  %v404_v23 = vpack.c.bf16 %v155_v19, %v154_v18  ;;  %v157_v25 = vld [vmem:[#allocation4 + $0x38] sm:$0xff]  ;;  %v60_v27 = vld [vmem:[#allocation2 + $0x50] sm:$0xff] }
  0x2c   :  { %397 = vmatprep.subr.bf16.mxu1 %v396_v15  ;;  %v380_v26 = vpack.c.bf16 %v59_v22, %v58_v21  ;;  %v61_v28 = vld [vmem:[#allocation2 + $0x58] sm:$0xff]  ;;  %v408_v29 = vpack.c.bf16 %v157_v25, %v156_v24  ;;  %v158_v30 = vld [vmem:[#allocation4 + $0x40] sm:$0xff]  ;;  %v159_v31 = vld [vmem:[#allocation4 + $0x48] sm:$0xff] }
  0x2d   :  { %371 = vmatpush3.bf16.msra.mxu0 %v368_v5  ;;  %399 = vmatpush3.bf16.msra.mxu1 %v396_v15  ;;  %v384_v32 = vpack.c.bf16 %v61_v28, %v60_v27  ;;  %v62_v33 = vld [vmem:[#allocation2 + $0x60] sm:$0xff]  ;;  %v63_v34 = vld [vmem:[#allocation2 + $0x68] sm:$0xff]  ;;  %v412_v35 = vpack.c.bf16 %v159_v31, %v158_v30  ;;  %v160_v36 = vld [vmem:[#allocation4 + $0x50] sm:$0xff] }
  0x2e   :  { %373 = vmatprep.subr.bf16.mxu0 %v372_v8  ;;  %401 = vmatprep.subr.bf16.mxu1 %v400_v17  ;;  %v161_v37 = vld [vmem:[#allocation4 + $0x58] sm:$0xff]  ;;  %v388_v38 = vpack.c.bf16 %v63_v34, %v62_v33  ;;  %v64_v39 = vld [vmem:[#allocation2 + $0x70] sm:$0xff]  ;;  %v162_v42 = vld [vmem:[#allocation4 + $0x60] sm:$0xff] }
  0x2f   :  { %v65_v40 = vld [vmem:[#allocation2 + $0x78] sm:$0xff]  ;;  %v416_v41 = vpack.c.bf16 %v161_v37, %v160_v36  ;;  %v163_v43 = vld [vmem:[#allocation4 + $0x68] sm:$0xff]  ;;  %v164_v47 = vld [vmem:[#allocation4 + $0x70] sm:$0xff] }
  0x30   :  { %v392_v44 = vpack.c.bf16 %v65_v40, %v64_v39  ;;  %v420_v45 = vpack.c.bf16 %v163_v43, %v162_v42  ;;  %v49_v46 = vld [vmem:[%s556_s0 + $0x8] sm:$0xff]  ;;  %v165_v48 = vld [vmem:[#allocation4 + $0x78] sm:$0xff]  ;;  %v256_v50 = vld [vmem:[%s558_s2] ss:$0 sm:$0xff] }
  0x31   :  { %375 = vmatpush3.bf16.msra.mxu0 %v372_v8  ;;  %403 = vmatpush3.bf16.msra.mxu1 %v400_v17  ;;  %v424_v49 = vpack.c.bf16 %v165_v48, %v164_v47  ;;  %v257_v57 = vld [vmem:[%s560_s4] ss:$0 sm:$0xff] }
  0x32   :  { %377 = vmatprep.subr.bf16.mxu0 %v376_v20  ;;  %405 = vmatprep.subr.bf16.mxu1 %v404_v23 }
  0x35   :  { %379 = vmatpush3.bf16.msra.mxu0 %v376_v20  ;;  %407 = vmatpush3.bf16.msra.mxu1 %v404_v23 }
  0x36   :  { %381 = vmatprep.subr.bf16.mxu0 %v380_v26  ;;  %409 = vmatprep.subr.bf16.mxu1 %v408_v29 }
  0x39   :  { %383 = vmatpush3.bf16.msra.mxu0 %v380_v26  ;;  %411 = vmatpush3.bf16.msra.mxu1 %v408_v29 }
  0x3a   :  { %385 = vmatprep.subr.bf16.mxu0 %v384_v32  ;;  %413 = vmatprep.subr.bf16.mxu1 %v412_v35 }
  0x3d   :  { %387 = vmatpush3.bf16.msra.mxu0 %v384_v32  ;;  %415 = vmatpush3.bf16.msra.mxu1 %v412_v35 }
  0x3e   :  { %389 = vmatprep.subr.bf16.mxu0 %v388_v38  ;;  %417 = vmatprep.subr.bf16.mxu1 %v416_v41 }
  0x41   :  { %391 = vmatpush3.bf16.msra.mxu0 %v388_v38  ;;  %419 = vmatpush3.bf16.msra.mxu1 %v416_v41 }
  0x42   :  { %393 = vmatprep.subr.bf16.mxu0 %v392_v44  ;;  %421 = vmatprep.subr.bf16.mxu1 %v420_v45 }
  0x45   :  { %395 = vmatpush3.bf16.msra.mxu0 %v392_v44  ;;  %423 = vmatpush3.bf16.msra.mxu1 %v420_v45 }
  0x46   :  { %425 = vmatprep.subr.bf16.mxu1 %v424_v49 }
  0x48   :  { %327 = vmatmul.mubr.f32.vlgmr.msra.gmra.mrb[0].mxu0 %v49_v46 }
  0x49   :  { %427 = vmatpush3.bf16.msra.mxu1 %v424_v49 }
 0x11b   :  { %v328_v51 = vpop.f32.mrb[0].mxu0 }
 0x11c   :  { %v145_v52 = vadd.f32 %v328_v51, %v256_v50  ;;  %v139_v53 = vpop.f32.mrb[1].mxu0 }
 0x11d   :  { %v140_v54 = vadd.f32 %v256_v50, %v139_v53 }
 0x11e   :  { %v149_v56 = vmax.f32 %v145_v52, 0.0 }
 0x11f   :  { %v148_v55 = vmax.f32 %v140_v54, 0.0 }
 0x121   :  { %361 = vmatprep.mubr.f32.mxu1 %v148_v55 }
 0x122   :  { %362 = vmatmul.mubr.f32.vlgmr.msra.gmra.mrb[0].mxu1 %v149_v56 }
 0x1f5   :  { %v363_v58 = vpop.f32.mrb[0].mxu1 }
 0x1f6   :  { %v245_v59 = vadd.f32 %v363_v58, %v257_v57  ;;  %v239_v60 = vpop.f32.mrb[1].mxu1 }
 0x1f7   :  { %v240_v61 = vadd.f32 %v257_v57, %v239_v60 }
 0x1f8   :  { %249 = vst [vmem:[%s561_s5 + $0x8] sm:$0xff] %v245_v59 }
 0x1f9   :  { %248 = vst [vmem:[%s561_s5] sm:$0xff] %v240_v61 }
 0x1fa   :  { %254 = vsyncpa [#allocation3], 1 }
 0x1fb   :  { %255 = vsyncpa [#allocation5], 1 }

</bundles_post_ra>
